<compile_context>
chip_gen: v7x
topology: tpu7x:2x2x1
jax: 0.10.0
libtpu: 0.0.40
codegen_flags: <defaults>
</compile_context>

<pallas_src>
import jax
import jax.numpy as jnp
from jax.experimental import pallas as pl
from jax.experimental.pallas import tpu as pltpu


def _round_up(x, m):
    return ((x + m - 1) // m) * m


def mlp_readout_kernel(x_ref, w0_ref, b0_ref, w1_ref, b1_ref, w2_ref, b2_ref,
                       o_ref):
    # Layer 0: Linear + ReLU
    y = jnp.dot(x_ref[...], w0_ref[...], preferred_element_type=jnp.float32)
    y = jnp.maximum(y + b0_ref[...], 0.0)
    # Layer 1: Linear + ReLU
    y = jnp.dot(y, w1_ref[...], preferred_element_type=jnp.float32)
    y = jnp.maximum(y + b1_ref[...], 0.0)
    # Final layer: Linear (narrow output block; few masked stores are cheaper
    # than inflating HBM writeback by 128/out_dim).
    y = jnp.dot(y, w2_ref[...], preferred_element_type=jnp.float32)
    o_ref[...] = (y + b2_ref[...]).astype(o_ref.dtype)


def _vmem_budget_bytes():
    """~75% of this generation's per-core VMEM (48 MiB on v7x, 96 MiB on
    v5e/v6e), used both for tile sizing and as vmem_limit_bytes."""
    cap = 64 << 20  # conservative fallback = v7x per-core VMEM
    try:
        info = pltpu.get_tpu_info()
        cap = int(getattr(info, "vmem_capacity_bytes", cap))
    except Exception:
        pass
    return (cap * 3) // 4


def _choose_tm(B, D, d1, d2, out_dim, weight_bytes, vmem_budget):
    """Largest batch tile (multiple of 8, <=8192) whose f32 working set fits
    the budget after subtracting the single-buffered weight footprint:
    x tile (x2 pipeline buffers) + out tile (x2) + the two hidden
    intermediates, plus headroom for compiler scratch."""
    per_row = 4 * (2 * D + 2 * out_dim + d1 + d2)
    headroom = 2 << 20
    avail = max(vmem_budget - weight_bytes - headroom, 8 * per_row)
    tm = (avail // per_row) // 8 * 8
    tm = max(8, min(tm, 8192))
    # No point exceeding the (sublane-rounded) batch.
    tm = min(tm, _round_up(B, 8))
    # Keep >= 2 grid steps so the "parallel" batch axis can span both
    # TensorCores on v7x (no-op on single-TC v5e/v6e).
    if B >= 16:
        tm = min(tm, _round_up(pl.cdiv(B, 2), 8))
    return max(8, tm)


def mlp_readout(x, params, *, tm=None):
    """x: (B, input_dim) float32.  params: ((w0,b0),(w1,b1),(w2,b2)) with
    w stored as (in, out) and b as (1, out)."""
    (w0, b0), (w1, b1), (w2, b2) = params
    B, D = x.shape
    d1, d2 = w0.shape[1], w1.shape[1]
    out_dim = w2.shape[1]

    # Single-buffered (Buffered(1)) weight/bias footprint.
    weight_bytes = 4 * sum(int(p.size) for p in (w0, b0, w1, b1, w2, b2))
    vmem_budget = _vmem_budget_bytes()

    if tm is None:
        tm = _choose_tm(B, D, d1, d2, out_dim, weight_bytes, vmem_budget)
    tm = max(8, (int(tm) // 8) * 8)

    # Ragged batch: pl.cdiv grid; Pallas handles the partial last block
    # (no wrapper-side padding / extra HBM pass over x).
    grid = (pl.cdiv(B, tm),)
    const = lambda i: (0, 0)  # weights/biases: same block every step

    flops = 2 * B * (D * d1 + d1 * d2 + d2 * out_dim)
    bytes_accessed = 4 * (B * D + B * out_dim) + weight_bytes

    out = pl.pallas_call(
        mlp_readout_kernel,
        out_shape=jax.ShapeDtypeStruct((B, out_dim), x.dtype),
        grid_spec=pl.GridSpec(
            grid=grid,
            in_specs=[
                pl.BlockSpec((tm, D), lambda i: (i, 0)),   # x batch tile
                pl.BlockSpec(w0.shape, const, pipeline_mode=pl.Buffered(1)),
                pl.BlockSpec(b0.shape, const, pipeline_mode=pl.Buffered(1)),
                pl.BlockSpec(w1.shape, const, pipeline_mode=pl.Buffered(1)),
                pl.BlockSpec(b1.shape, const, pipeline_mode=pl.Buffered(1)),
                pl.BlockSpec(w2.shape, const, pipeline_mode=pl.Buffered(1)),
                pl.BlockSpec(b2.shape, const, pipeline_mode=pl.Buffered(1)),
            ],
            out_specs=pl.BlockSpec((tm, out_dim), lambda i: (i, 0)),
        ),
        compiler_params=pltpu.CompilerParams(
            dimension_semantics=("parallel",),
            vmem_limit_bytes=vmem_budget,
        ),
        cost_estimate=pl.CostEstimate(
            flops=flops, transcendentals=0, bytes_accessed=bytes_accessed),
    )(x, w0, b0, w1, b1, w2, b2)

    return out


def init_params(key, input_dim, output_dim, L=2):
    """Deterministic init matching the PyTorch layer shapes.

    PyTorch Linear(in, out) has weight (out, in); we store its transpose
    (in, out) and bias as (1, out)."""
    dims = [input_dim // (2 ** l) for l in range(L + 1)] + [output_dim]
    params = []
    for l in range(L + 1):
        key, kw, kb = jax.random.split(key, 3)
        fan_in, fan_out = dims[l], dims[l + 1]
        bound = 1.0 / jnp.sqrt(fan_in)
        w = jax.random.uniform(kw, (fan_in, fan_out), jnp.float32,
                               minval=-bound, maxval=bound)
        b = jax.random.uniform(kb, (1, fan_out), jnp.float32,
                               minval=-bound, maxval=bound)
        params.append((w, b))
    return tuple(params)


def mlp_readout_ref(x, params, L=2):
    y = x
    for l in range(L):
        w, b = params[l]
        y = jnp.maximum(y @ w + b, 0.0)
    w, b = params[L]
    return y @ w + b


if __name__ == "__main__":
    key = jax.random.PRNGKey(0)
    B, input_dim, output_dim, L = 16, 32, 4, 2

    key, kx = jax.random.split(key)
    x = jax.random.normal(kx, (B, input_dim), jnp.float32)
    params = init_params(key, input_dim, output_dim, L=L)

    out = mlp_readout(x, params)
    out = jax.block_until_ready(out)

    ref = mlp_readout_ref(x, params, L=L)
    assert out.shape == (B, output_dim)
    assert jnp.allclose(out, ref, atol=1e-5, rtol=1e-5), "mismatch vs reference"

    # Ragged batch (not divisible by the tile, exercises the partial block).
    x2 = jax.random.normal(jax.random.PRNGKey(1), (B + 3, input_dim), jnp.float32)
    out2 = jax.block_until_ready(mlp_readout(x2, params))
    ref2 = mlp_readout_ref(x2, params, L=L)
    assert out2.shape == (B + 3, output_dim)
    assert jnp.allclose(out2, ref2, atol=1e-5, rtol=1e-5), "ragged mismatch"

    print("KERNEL_OK")
</pallas_src>

<mosaic_0001>
module attributes {stable_mosaic.version = 11 : i64} {
  func.func @mlp_readout_kernel(%arg0: i32, %arg1: memref<8x32xf32, #tpu.memory_space<vmem>>, %arg2: memref<32x16xf32, #tpu.memory_space<vmem>>, %arg3: memref<1x16xf32, #tpu.memory_space<vmem>>, %arg4: memref<16x8xf32, #tpu.memory_space<vmem>>, %arg5: memref<1x8xf32, #tpu.memory_space<vmem>>, %arg6: memref<8x4xf32, #tpu.memory_space<vmem>>, %arg7: memref<1x4xf32, #tpu.memory_space<vmem>>, %arg8: memref<8x4xf32, #tpu.memory_space<vmem>>) attributes {dimension_semantics = [#tpu.dimension_semantics<parallel>], iteration_bounds = array<i64: 2>, scalar_prefetch = 0 : i64, scratch_operands = 0 : i64, tpu.core_type = #tpu.core_type<tc>, window_params = [{transform_indices = @transform_0, window_bounds = array<i64: 8, 32>}, {pipeline_mode = #tpu.pipeline_mode<synchronous>, transform_indices = @transform_1, window_bounds = array<i64: 32, 16>}, {pipeline_mode = #tpu.pipeline_mode<synchronous>, transform_indices = @transform_2, window_bounds = array<i64: 1, 16>}, {pipeline_mode = #tpu.pipeline_mode<synchronous>, transform_indices = @transform_3, window_bounds = array<i64: 16, 8>}, {pipeline_mode = #tpu.pipeline_mode<synchronous>, transform_indices = @transform_4, window_bounds = array<i64: 1, 8>}, {pipeline_mode = #tpu.pipeline_mode<synchronous>, transform_indices = @transform_5, window_bounds = array<i64: 8, 4>}, {pipeline_mode = #tpu.pipeline_mode<synchronous>, transform_indices = @transform_6, window_bounds = array<i64: 1, 4>}, {transform_indices = @transform_7, window_bounds = array<i64: 8, 4>}]} {
    %c0 = arith.constant 0 : index
    %c0_0 = arith.constant 0 : index
    %0 = vector.load %arg1[%c0, %c0_0] : memref<8x32xf32, #tpu.memory_space<vmem>>, vector<8x32xf32>
    %c0_1 = arith.constant 0 : index
    %c0_2 = arith.constant 0 : index
    %1 = vector.load %arg2[%c0_1, %c0_2] : memref<32x16xf32, #tpu.memory_space<vmem>>, vector<32x16xf32>
    %cst = arith.constant dense<0.000000e+00> : vector<8x16xf32>
    %2 = tpu.matmul %0, %1, %cst {dimension_numbers = #tpu.dot_dimension_numbers<[1], [0], [0], [1], [0, 0, 1, 1], [], []>} : vector<8x32xf32>, vector<32x16xf32>, vector<8x16xf32> -> vector<8x16xf32>
    %c0_3 = arith.constant 0 : index
    %c0_4 = arith.constant 0 : index
    %3 = vector.load %arg3[%c0_3, %c0_4] : memref<1x16xf32, #tpu.memory_space<vmem>>, vector<1x16xf32>
    %4 = vector.broadcast %3 : vector<1x16xf32> to vector<8x16xf32>
    %5 = arith.addf %2, %4 : vector<8x16xf32>
    %cst_5 = arith.constant 0.000000e+00 : f32
    %6 = vector.broadcast %cst_5 : f32 to vector<8x16xf32>
    %7 = arith.maximumf %5, %6 : vector<8x16xf32>
    %c0_6 = arith.constant 0 : index
    %c0_7 = arith.constant 0 : index
    %8 = vector.load %arg4[%c0_6, %c0_7] : memref<16x8xf32, #tpu.memory_space<vmem>>, vector<16x8xf32>
    %cst_8 = arith.constant dense<0.000000e+00> : vector<8x8xf32>
    %9 = tpu.matmul %7, %8, %cst_8 {dimension_numbers = #tpu.dot_dimension_numbers<[1], [0], [0], [1], [0, 0, 1, 1], [], []>} : vector<8x16xf32>, vector<16x8xf32>, vector<8x8xf32> -> vector<8x8xf32>
    %c0_9 = arith.constant 0 : index
    %c0_10 = arith.constant 0 : index
    %10 = vector.load %arg5[%c0_9, %c0_10] : memref<1x8xf32, #tpu.memory_space<vmem>>, vector<1x8xf32>
    %11 = vector.broadcast %10 : vector<1x8xf32> to vector<8x8xf32>
    %12 = arith.addf %9, %11 : vector<8x8xf32>
    %cst_11 = arith.constant 0.000000e+00 : f32
    %13 = vector.broadcast %cst_11 : f32 to vector<8x8xf32>
    %14 = arith.maximumf %12, %13 : vector<8x8xf32>
    %c0_12 = arith.constant 0 : index
    %c0_13 = arith.constant 0 : index
    %15 = vector.load %arg6[%c0_12, %c0_13] : memref<8x4xf32, #tpu.memory_space<vmem>>, vector<8x4xf32>
    %cst_14 = arith.constant dense<0.000000e+00> : vector<8x4xf32>
    %16 = tpu.matmul %14, %15, %cst_14 {dimension_numbers = #tpu.dot_dimension_numbers<[1], [0], [0], [1], [0, 0, 1, 1], [], []>} : vector<8x8xf32>, vector<8x4xf32>, vector<8x4xf32> -> vector<8x4xf32>
    %c0_15 = arith.constant 0 : index
    %c0_16 = arith.constant 0 : index
    %17 = vector.load %arg7[%c0_15, %c0_16] : memref<1x4xf32, #tpu.memory_space<vmem>>, vector<1x4xf32>
    %18 = vector.broadcast %17 : vector<1x4xf32> to vector<8x4xf32>
    %19 = arith.addf %16, %18 : vector<8x4xf32>
    %c0_17 = arith.constant 0 : index
    %c0_18 = arith.constant 0 : index
    %20 = vector.load %arg8[%c0_17, %c0_18] : memref<8x4xf32, #tpu.memory_space<vmem>>, vector<8x4xf32>
    tpu.vector_store %arg8[%c0_17, %c0_18], %19 {strides = array<i32>} : memref<8x4xf32, #tpu.memory_space<vmem>>, vector<8x4xf32>,
    return
  }
  func.func @transform_0(%arg0: i32) -> (i32, i32) {
    %c0_i32 = arith.constant 0 : i32
    %c0_i32_0 = arith.constant 0 : i32
    return %arg0, %c0_i32 : i32, i32
  }
  func.func @transform_1(%arg0: i32) -> (i32, i32) {
    %c0_i32 = arith.constant 0 : i32
    %c0_i32_0 = arith.constant 0 : i32
    %c0_i32_1 = arith.constant 0 : i32
    return %c0_i32, %c0_i32_0 : i32, i32
  }
  func.func @transform_2(%arg0: i32) -> (i32, i32) {
    %c0_i32 = arith.constant 0 : i32
    %c0_i32_0 = arith.constant 0 : i32
    %c0_i32_1 = arith.constant 0 : i32
    return %c0_i32, %c0_i32_0 : i32, i32
  }
  func.func @transform_3(%arg0: i32) -> (i32, i32) {
    %c0_i32 = arith.constant 0 : i32
    %c0_i32_0 = arith.constant 0 : i32
    %c0_i32_1 = arith.constant 0 : i32
    return %c0_i32, %c0_i32_0 : i32, i32
  }
  func.func @transform_4(%arg0: i32) -> (i32, i32) {
    %c0_i32 = arith.constant 0 : i32
    %c0_i32_0 = arith.constant 0 : i32
    %c0_i32_1 = arith.constant 0 : i32
    return %c0_i32, %c0_i32_0 : i32, i32
  }
  func.func @transform_5(%arg0: i32) -> (i32, i32) {
    %c0_i32 = arith.constant 0 : i32
    %c0_i32_0 = arith.constant 0 : i32
    %c0_i32_1 = arith.constant 0 : i32
    return %c0_i32, %c0_i32_0 : i32, i32
  }
  func.func @transform_6(%arg0: i32) -> (i32, i32) {
    %c0_i32 = arith.constant 0 : i32
    %c0_i32_0 = arith.constant 0 : i32
    %c0_i32_1 = arith.constant 0 : i32
    return %c0_i32, %c0_i32_0 : i32, i32
  }
  func.func @transform_7(%arg0: i32) -> (i32, i32) {
    %c0_i32 = arith.constant 0 : i32
    %c0_i32_0 = arith.constant 0 : i32
    return %arg0, %c0_i32 : i32, i32
  }
}

</mosaic_0001>

<bundles_post_ra>
// kernel: tpu_custom_call.1
= control target key start
LH: loop header
LB: loop body
LE: loop exit
PB: predicated region body
PF: predicated region fallthrough
CT: control target
= control target key end

     0   :  { %s701_s24 = smov 0   ;;  %s758_s0 = inlined_call_operand.vmem [shape: f32[16,32], index: 0, kind: input, shape index: {}]   ;;  %s759_s1 = inlined_call_operand.vmem [shape: f32[32,16], index: 1, kind: input, shape index: {}]   ;;  %s760_s2 = inlined_call_operand.vmem [shape: f32[1,16], index: 2, kind: input, shape index: {}]   ;;  %s761_s3 = inlined_call_operand.vmem [shape: f32[16,8], index: 3, kind: input, shape index: {}]   ;;  %s762_s4 = inlined_call_operand.vmem [shape: f32[1,8], index: 4, kind: input, shape index: {}]   ;;  %s763_s5 = inlined_call_operand.vmem [shape: f32[8,4], index: 5, kind: input, shape index: {}]   ;;  %s764_s6 = inlined_call_operand.vmem [shape: f32[1,4], index: 6, kind: input, shape index: {}]   ;;  %s765_s7 = inlined_call_operand.vmem [shape: f32[16,4], index: 7, kind: output, shape index: {}]  }
   0x1 LB: > { %s582_s25 = sadd.s32 4294967295, %s656_s24   ;;  %p586_p0 = scmp.ge.s32.totalorder %s656_s24, 1  ;;  %s656_s24 = sphi %s701_s24, %s17_s24  }
   0x2   : > { %p236_p1 = scmp.lt.s32.totalorder %s656_s24, 3 }
   0x4   : > { %p237_p2 = pnand %p586_p0, %p236_p1 }
   0x5   : > { %v275_v0 = vld [vmem:[%s759_s1] sm:$0xff] (!%p237_p2)  ;;  %v276_v1 = vld [vmem:[%s759_s1 + $0x8] sm:$0xff] (!%p237_p2)  ;;  %v277_v2 = vld [vmem:[%s759_s1 + $0x10] sm:$0xff] (!%p237_p2)  ;;  %v658_v3 = vmov (!%p237_p2), 0.0|0.0   ;;  %vm659_vm0 = vmmov (!%p237_p2), 0   ;;  %v660_v6 = vmov (!%p237_p2), 0.0  }
   0x6   : > { %240 = sbr.rel (%p237_p2) target bundleno = 664 (0x298), region = 48  ;;  %630 = vmatprep.subr.bf16.mxu0 (!%p237_p2), %v658_v3  ;;  %v631_v4 = vpack.c.bf16 (!%p237_p2), %v276_v1, %v275_v0  ;;  %v278_v5 = vld [vmem:[%s759_s1 + $0x18] sm:$0xff] (!%p237_p2)  ;;  %615 = vmatprep.mubr.msk.f32.mxu0 (!%p237_p2), %vm659_vm0, %v660_v6  ;;  %p266_p3 = scmp.lt.s32.totalorder (!%p237_p2), %s582_s25, 1  ;;  %vm286_vm1 = vcmask (!%p237_p2), 261120   ;;  %v361_v9 = vld [vmem:[%s761_s3] sm:$0xff] (!%p237_p2)  ;;  %v362_v10 = vld [vmem:[%s761_s3 + $0x8] sm:$0xff] (!%p237_p2) }
   0x7   : > { %636 = vmatprep.subr.bf16.mxu1 (!%p237_p2), %v658_v3  ;;  %622 = vmatprep.mubr.msk.f32.mxu1 (!%p237_p2), %vm659_vm0, %v660_v6  ;;  %v634_v7 = vpack.c.bf16 (!%p237_p2), %v278_v5, %v277_v2  ;;  %v637_v11 = vpack.c.bf16 (!%p237_p2), %v362_v10, %v361_v9  ;;  %v589_v12 = vld [vmem:[%s760_s2] ss:$0 sm:$0xff] (!%p237_p2)  ;;  %vm370_vm2 = vcmask (!%p237_p2), 130048   ;;  %vm453_vm3 = vcmask (!%p237_p2), 64512  }
   0x8   : > { %632 = vmatpush3.bf16.msra.mxu0 (!%p237_p2), %v631_v4  ;;  %v445_v17 = vld [vmem:[%s763_s5] sm:$0xff] (!%p237_p2)  ;;  %vm527_vm4 = vcmask (!%p237_p2), 31744  }
   0x9   : > { %633 = vmatprep.subr.bf16.mxu0 (!%p237_p2), %v658_v3  ;;  %638 = vmatpush3.bf16.msra.mxu1 (!%p237_p2), %v637_v11  ;;  %v591_v18 = vld [vmem:[%s762_s4] ss:$0 sm:$0xff] (!%p237_p2) }
   0xa   : > { %625 = vmatprep.subr.mxu1 (!%p237_p2), %v660_v6  ;;  %v593_v23 = vld [vmem:[%s764_s6] ss:$0 sm:$0xff] (!%p237_p2) }
   0xc   : > { %635 = vmatpush3.bf16.msra.mxu0 (!%p237_p2), %v634_v7 }
   0xd   : > { %s767_s25 = smov (!%p266_p3, %s582_s25), 1 }
   0xe   : > { %s587_s11 = sshll.u32 %s767_s25, 3 }
   0xf   : > { %s269_s14 = scalar_lea.vmem %s758_s0, %s587_s11  ;;  %s273_s8 = scalar_lea.vmem %s765_s7, %s587_s11 }
  0x10   : > { %v274_v8 = vld [vmem:[%s269_s14] sm:$0xff] }
  0x11   : > { %616 = vmatmul.mubr.msk.f32.vlgmr.msra.gmra.mrb[0].mxu0 %vm286_vm1, %v274_v8 }
  0xe4   : > { %v356_v13 = vpop.f32.mrb[0].mxu0 }
  0xe5   : > { %v357_v14 = vadd.f32 %v589_v12, %v356_v13  ;;  %v617_v15 = vpop.f32.mrb[1].mxu0 }
  0xe7   : > { %v360_v16 = vmax.f32 %v357_v14, 0.0 }
  0xe9   : > { %623 = vmatmul.mubr.msk.f32.vlgmr.msra.gmra.mrb[0].mxu1 %vm370_vm2, %v360_v16 }
  0xea   : > { %627 = vmatprep.mubr.msk.f32.mxu1 %vm659_vm0, %v660_v6  ;;  %626 = vmatpush3.msra.mxu1 %v445_v17 }
 0x1bc   : > { %v440_v19 = vpop.f32.mrb[0].mxu1 }
 0x1bd   : > { %v441_v20 = vadd.f32 %v591_v18, %v440_v19  ;;  %v624_v21 = vpop.f32.mrb[1].mxu1 }
 0x1bf   : > { %v444_v22 = vmax.f32 %v441_v20, 0.0 }
 0x1c1   : > { %628 = vmatmul.mubr.msk.f32.vlgmr.msra.gmra.mrb[2].mxu1 %vm453_vm3, %v444_v22 }
 0x294   : > { %v523_v24 = vpop.f32.mrb[2].mxu1 }
 0x295   : > { %v524_v25 = vadd.f32 %v593_v23, %v523_v24  ;;  %v629_v26 = vpop.f32.mrb[3].mxu1 }
 0x297   : > { %528 = vst.msk [vmem:[%s273_s8] sm:$0xff] %vm527_vm4, %v524_v25 }
 0x298 PF: > { %s17_s24 = sadd.s32 1, %s656_s24  }
 0x299   : > { %p14_p4 = scmp.ge.s32.totalorder %s17_s24, 4  }
 0x29b   :  { %16 = sbr.rel (!%p14_p4) target bundleno = 1 (0x1), region = 78 }

</bundles_post_ra>
